<compile_context>
chip_gen: v6e
topology: v6e:2x2x1
jax: 0.10.0
libtpu: 0.0.40
codegen_flags: <defaults>
</compile_context>

<pallas_src>
import functools

import jax
import jax.numpy as jnp
from jax.experimental import pallas as pl
from jax.experimental.pallas import tpu as pltpu

LANE = 128


def _round_up(x, m):
    return (x + m - 1) // m * m


def _sublane(dtype):
    # Sub-32-bit dtypes pack rows along sublanes: align batch tiles to the packed
    # row granularity (8 rows for f32, 16 for bf16, 32 for int8/fp8).
    return 8 * max(1, 4 // jnp.dtype(dtype).itemsize)


def _vmem_capacity_bytes():
    try:
        return int(pltpu.get_tpu_info().vmem_capacity_bytes)
    except Exception:
        return 64 * 2**20  # conservative fallback (v7x physical VMEM per TC)


def _mlp_kernel(x_ref, w1_ref, b1_ref, w2_ref, b2_ref, w3_ref, b3_ref, o_ref):
    """Fused (Linear -> ReLU) x2 -> Linear on one batch tile.

    Matmuls run in the weights' dtype (f32 or bf16) with f32 accumulation; the
    bias add + ReLU epilogue stays in f32. The cast of x happens here (mirrors
    x.float(); in the bf16 path the input is quantized to bf16 for the MXU).
    """
    cdt = w1_ref.dtype
    x = x_ref[...].astype(cdt)

    h1 = jnp.dot(x, w1_ref[...], preferred_element_type=jnp.float32) + b1_ref[...]
    h1 = jnp.maximum(h1, 0.0).astype(cdt)

    h2 = jnp.dot(h1, w2_ref[...], preferred_element_type=jnp.float32) + b2_ref[...]
    h2 = jnp.maximum(h2, 0.0).astype(cdt)

    o_ref[...] = (
        jnp.dot(h2, w3_ref[...], preferred_element_type=jnp.float32) + b3_ref[...]
    ).astype(o_ref.dtype)


@functools.partial(jax.jit, static_argnames=("block_b",))
def botnn_forward(x, params, *, block_b=None):
    """BotNN forward pass with a fused Pallas kernel.

    x: [B, input_layer_count] (any real dtype; cast to the compute dtype in-kernel)
    params: *prepared* params from prepare_botnn_params(): weights stored as
            [in, out] with the hidden dim zero-padded to a multiple of 128 and
            cast to the compute dtype (f32 exact, or bf16 — a good choice on
            v5e/v6e/v7x alike since all three MXUs take bf16 natively); biases f32.
    Returns: [B, class_count] float32.
    """
    w1, b1 = params["w1"], params["b1"]
    w2, b2 = params["w2"], params["b2"]
    w3, b3 = params["w3"], params["b3"]

    B, F_in = x.shape
    H_pad = w1.shape[1]          # already padded to a multiple of 128 at prepare time
    C = w3.shape[1]

    cdt = w1.dtype
    w_item = jnp.dtype(cdt).itemsize
    x_item = jnp.dtype(x.dtype).itemsize
    sub = _sublane(cdt)

    vmem_cap = _vmem_capacity_bytes()
    vmem_budget = (2 * vmem_cap) // 3   # ~42 MiB on v7x, ~85 MiB on v5e/v6e

    # --- batch tile selection ------------------------------------------------
    if block_b is None:
        b_rounded = _round_up(B, sub)
        if B >= 512:
            # >=2 tiles so both v7x TensorCores get work via the "parallel" axis,
            # while keeping tiles as fat as possible (<=2048 rows) to amortize the
            # ~0.35 us/grid-step pipeline overhead on every generation.
            n_tiles = max(2, pl.cdiv(b_rounded, 2048))
            block_b = _round_up(pl.cdiv(B, n_tiles), sub)
        else:
            block_b = b_rounded
    block_b = max(sub, min(_round_up(block_b, sub), _round_up(B, sub)))

    def vmem_bytes(bb):
        x_io = 2 * bb * F_in * x_item                       # double-buffered x tiles
        o_io = 2 * bb * C * 4                               # double-buffered out tiles
        w = 2 * (F_in * H_pad + H_pad * H_pad + H_pad * C) * w_item
        bias = 2 * (2 * H_pad + C) * 4
        act = 2 * bb * H_pad * (4 + w_item) + bb * F_in * w_item  # f32 h1/h2 + casts
        return x_io + o_io + w + bias + act

    # If the resident weights alone exceed the budget, shrinking block_b cannot fix it.
    # TODO(synk): tile the hidden dim (extra grid axis + f32 accumulator) for very large H.
    while block_b > sub and vmem_bytes(block_b) > vmem_budget:
        block_b = max(sub, _round_up(block_b // 2, sub))

    grid_b = pl.cdiv(B, block_b)
    B_pad = grid_b * block_b
    # Batch-only zero pad, and only when the tile doesn't divide B (no-op in the
    # common case; no feature-dim pad / dtype cast pass over x in HBM).
    x_in = x if B_pad == B else jnp.pad(x, ((0, B_pad - B), (0, 0)))

    need = vmem_bytes(block_b)
    vmem_limit = int(min(vmem_cap - (2 << 20), max(32 << 20, 2 * need + (8 << 20))))

    flops = 2 * B_pad * (F_in * H_pad + H_pad * H_pad + H_pad * C)
    bytes_accessed = (
        B_pad * F_in * x_item
        + (F_in * H_pad + H_pad * H_pad + H_pad * C) * w_item
        + (2 * H_pad + C) * 4
        + B_pad * C * 4
    )

    batch_tile = lambda i: (i, 0)
    whole = lambda i: (0, 0)  # constant index: weights stay resident, no re-fetch per tile

    out = pl.pallas_call(
        _mlp_kernel,
        out_shape=jax.ShapeDtypeStruct((B_pad, C), jnp.float32),
        grid=(grid_b,),
        in_specs=[
            pl.BlockSpec((block_b, F_in), batch_tile),  # x tile (full feature dim)
            pl.BlockSpec((F_in, H_pad), whole),         # w1
            pl.BlockSpec((1, H_pad), whole),            # b1
            pl.BlockSpec((H_pad, H_pad), whole),        # w2
            pl.BlockSpec((1, H_pad), whole),            # b2
            pl.BlockSpec((H_pad, C), whole),            # w3 (full class dim)
            pl.BlockSpec((1, C), whole),                # b3
        ],
        out_specs=pl.BlockSpec((block_b, C), batch_tile),   # full class dim, no pad
        compiler_params=pltpu.CompilerParams(
            dimension_semantics=("parallel",),
            vmem_limit_bytes=vmem_limit,
        ),
        cost_estimate=pl.CostEstimate(
            flops=flops, transcendentals=0, bytes_accessed=bytes_accessed
        ),
    )(x_in, w1, b1, w2, b2, w3, b3)

    return out if B_pad == B else out[:B]


def init_botnn_params(key, input_layer_count, hidden_layer_count, class_count):
    """Deterministic init mimicking torch.nn.Linear (uniform +-1/sqrt(fan_in)).

    Weights are stored as [in, out] (transpose of PyTorch's [out, in])."""
    keys = jax.random.split(key, 6)

    def linear(kw, kb, fan_in, fan_out):
        bound = 1.0 / jnp.sqrt(jnp.float32(fan_in))
        w = jax.random.uniform(kw, (fan_in, fan_out), jnp.float32, -bound, bound)
        b = jax.random.uniform(kb, (1, fan_out), jnp.float32, -bound, bound)
        return w, b

    w1, b1 = linear(keys[0], keys[1], input_layer_count, hidden_layer_count)
    w2, b2 = linear(keys[2], keys[3], hidden_layer_count, hidden_layer_count)
    w3, b3 = linear(keys[4], keys[5], hidden_layer_count, class_count)
    return {"w1": w1, "b1": b1, "w2": w2, "b2": b2, "w3": w3, "b3": b3}


def prepare_botnn_params(params, compute_dtype=jnp.float32):
    """One-time pad/cast of the weights (done at init, NOT per forward call).

    Only the hidden dim is zero-padded to a multiple of 128 (exact: ReLU(0)=0 and
    padded columns contribute nothing downstream). Weights are cast to the MXU
    compute dtype (f32 exact, bf16 fast on v5e/v6e/v7x); biases stay f32 for the
    f32 bias/ReLU epilogue."""
    w1, b1 = params["w1"], params["b1"]
    w2, b2 = params["w2"], params["b2"]
    w3, b3 = params["w3"], params["b3"]
    F_in, H = w1.shape
    C = w3.shape[1]
    H_pad = _round_up(H, LANE)

    def pad2(a, shape):
        pads = [(0, s - d) for d, s in zip(a.shape, shape)]
        return a if all(p == (0, 0) for p in pads) else jnp.pad(a, pads)

    return {
        "w1": pad2(w1, (F_in, H_pad)).astype(compute_dtype),
        "b1": pad2(b1, (1, H_pad)).astype(jnp.float32),
        "w2": pad2(w2, (H_pad, H_pad)).astype(compute_dtype),
        "b2": pad2(b2, (1, H_pad)).astype(jnp.float32),
        "w3": pad2(w3, (H_pad, C)).astype(compute_dtype),
        "b3": pad2(b3, (1, C)).astype(jnp.float32),
    }


def botnn_reference(x, params):
    """Pure-JAX reference (uses the raw, unpadded params)."""
    h = jnp.maximum(x.astype(jnp.float32) @ params["w1"] + params["b1"], 0.0)
    h = jnp.maximum(h @ params["w2"] + params["b2"], 0.0)
    return h @ params["w3"] + params["b3"]


if __name__ == "__main__":
    # Small shapes consistent with the module: batch=8, input=32, hidden=64, classes=16
    B, F_IN, H, C = 8, 32, 64, 16

    key = jax.random.PRNGKey(0)
    k_x, k_p, k_x2 = jax.random.split(key, 3)

    x = jax.random.normal(k_x, (B, F_IN), dtype=jnp.float32)
    raw_params = init_botnn_params(k_p, F_IN, H, C)
    ref = botnn_reference(x, raw_params)

    # Exact f32 path.
    params_f32 = prepare_botnn_params(raw_params, jnp.float32)
    out = jax.block_until_ready(botnn_forward(x, params_f32))
    assert out.shape == (B, C)
    assert jnp.allclose(out, ref, atol=1e-4, rtol=1e-4)

    # bf16 MXU path (f32 accumulation) — recommended on v5e/v6e/v7x; looser tolerance
    # since x itself is quantized to bf16 in-kernel before the first matmul.
    params_bf16 = prepare_botnn_params(raw_params, jnp.bfloat16)
    out_bf16 = jax.block_until_ready(botnn_forward(x, params_bf16))
    assert out_bf16.shape == (B, C)
    assert jnp.allclose(out_bf16, ref, atol=1e-1, rtol=1e-1)

    # Larger, ragged batch to exercise multi-tile grid (>=2 parallel tiles) and the
    # batch-padding path.
    B2 = 4100
    x2 = jax.random.normal(k_x2, (B2, F_IN), dtype=jnp.float32)
    ref2 = botnn_reference(x2, raw_params)
    out2 = jax.block_until_ready(botnn_forward(x2, params_f32))
    assert out2.shape == (B2, C)
    assert jnp.allclose(out2, ref2, atol=1e-3, rtol=1e-3)

    print("KERNEL_OK")
</pallas_src>

<mosaic_0001>
module attributes {stable_mosaic.version = 11 : i64} {
  func.func @_mlp_kernel(%arg0: i32, %arg1: memref<8x32xf32, #tpu.memory_space<vmem>>, %arg2: memref<32x128xf32, #tpu.memory_space<vmem>>, %arg3: memref<1x128xf32, #tpu.memory_space<vmem>>, %arg4: memref<128x128xf32, #tpu.memory_space<vmem>>, %arg5: memref<1x128xf32, #tpu.memory_space<vmem>>, %arg6: memref<128x16xf32, #tpu.memory_space<vmem>>, %arg7: memref<1x16xf32, #tpu.memory_space<vmem>>, %arg8: memref<8x16xf32, #tpu.memory_space<vmem>>) attributes {dimension_semantics = [#tpu.dimension_semantics<parallel>], iteration_bounds = array<i64: 1>, scalar_prefetch = 0 : i64, scratch_operands = 0 : i64, tpu.core_type = #tpu.core_type<tc>, window_params = [{transform_indices = @transform_0, window_bounds = array<i64: 8, 32>}, {pipeline_mode = #tpu.pipeline_mode<synchronous>, transform_indices = @transform_1, window_bounds = array<i64: 32, 128>}, {pipeline_mode = #tpu.pipeline_mode<synchronous>, transform_indices = @transform_2, window_bounds = array<i64: 1, 128>}, {pipeline_mode = #tpu.pipeline_mode<synchronous>, transform_indices = @transform_3, window_bounds = array<i64: 128, 128>}, {pipeline_mode = #tpu.pipeline_mode<synchronous>, transform_indices = @transform_4, window_bounds = array<i64: 1, 128>}, {pipeline_mode = #tpu.pipeline_mode<synchronous>, transform_indices = @transform_5, window_bounds = array<i64: 128, 16>}, {pipeline_mode = #tpu.pipeline_mode<synchronous>, transform_indices = @transform_6, window_bounds = array<i64: 1, 16>}, {transform_indices = @transform_7, window_bounds = array<i64: 8, 16>}]} {
    %c0 = arith.constant 0 : index
    %c0_0 = arith.constant 0 : index
    %0 = vector.load %arg1[%c0, %c0_0] : memref<8x32xf32, #tpu.memory_space<vmem>>, vector<8x32xf32>
    %c0_1 = arith.constant 0 : index
    %c0_2 = arith.constant 0 : index
    %1 = vector.load %arg2[%c0_1, %c0_2] : memref<32x128xf32, #tpu.memory_space<vmem>>, vector<32x128xf32>
    %cst = arith.constant dense<0.000000e+00> : vector<8x128xf32>
    %2 = tpu.matmul %0, %1, %cst {dimension_numbers = #tpu.dot_dimension_numbers<[1], [0], [0], [1], [0, 0, 1, 1], [], []>} : vector<8x32xf32>, vector<32x128xf32>, vector<8x128xf32> -> vector<8x128xf32>
    %c0_3 = arith.constant 0 : index
    %c0_4 = arith.constant 0 : index
    %3 = vector.load %arg3[%c0_3, %c0_4] : memref<1x128xf32, #tpu.memory_space<vmem>>, vector<1x128xf32>
    %4 = vector.broadcast %3 : vector<1x128xf32> to vector<8x128xf32>
    %5 = arith.addf %2, %4 : vector<8x128xf32>
    %cst_5 = arith.constant 0.000000e+00 : f32
    %6 = vector.broadcast %cst_5 : f32 to vector<8x128xf32>
    %7 = arith.maximumf %5, %6 : vector<8x128xf32>
    %c0_6 = arith.constant 0 : index
    %c0_7 = arith.constant 0 : index
    %8 = vector.load %arg4[%c0_6, %c0_7] : memref<128x128xf32, #tpu.memory_space<vmem>>, vector<128x128xf32>
    %cst_8 = arith.constant dense<0.000000e+00> : vector<8x128xf32>
    %9 = tpu.matmul %7, %8, %cst_8 {dimension_numbers = #tpu.dot_dimension_numbers<[1], [0], [0], [1], [0, 0, 1, 1], [], []>} : vector<8x128xf32>, vector<128x128xf32>, vector<8x128xf32> -> vector<8x128xf32>
    %c0_9 = arith.constant 0 : index
    %c0_10 = arith.constant 0 : index
    %10 = vector.load %arg5[%c0_9, %c0_10] : memref<1x128xf32, #tpu.memory_space<vmem>>, vector<1x128xf32>
    %11 = vector.broadcast %10 : vector<1x128xf32> to vector<8x128xf32>
    %12 = arith.addf %9, %11 : vector<8x128xf32>
    %cst_11 = arith.constant 0.000000e+00 : f32
    %13 = vector.broadcast %cst_11 : f32 to vector<8x128xf32>
    %14 = arith.maximumf %12, %13 : vector<8x128xf32>
    %c0_12 = arith.constant 0 : index
    %c0_13 = arith.constant 0 : index
    %15 = vector.load %arg6[%c0_12, %c0_13] : memref<128x16xf32, #tpu.memory_space<vmem>>, vector<128x16xf32>
    %cst_14 = arith.constant dense<0.000000e+00> : vector<8x16xf32>
    %16 = tpu.matmul %14, %15, %cst_14 {dimension_numbers = #tpu.dot_dimension_numbers<[1], [0], [0], [1], [0, 0, 1, 1], [], []>} : vector<8x128xf32>, vector<128x16xf32>, vector<8x16xf32> -> vector<8x16xf32>
    %c0_15 = arith.constant 0 : index
    %c0_16 = arith.constant 0 : index
    %17 = vector.load %arg7[%c0_15, %c0_16] : memref<1x16xf32, #tpu.memory_space<vmem>>, vector<1x16xf32>
    %18 = vector.broadcast %17 : vector<1x16xf32> to vector<8x16xf32>
    %19 = arith.addf %16, %18 : vector<8x16xf32>
    %c0_17 = arith.constant 0 : index
    %c0_18 = arith.constant 0 : index
    %20 = vector.load %arg8[%c0_17, %c0_18] : memref<8x16xf32, #tpu.memory_space<vmem>>, vector<8x16xf32>
    tpu.vector_store %arg8[%c0_17, %c0_18], %19 {strides = array<i32>} : memref<8x16xf32, #tpu.memory_space<vmem>>, vector<8x16xf32>,
    return
  }
  func.func @transform_0(%arg0: i32) -> (i32, i32) {
    %c0_i32 = arith.constant 0 : i32
    %c0_i32_0 = arith.constant 0 : i32
    return %arg0, %c0_i32 : i32, i32
  }
  func.func @transform_1(%arg0: i32) -> (i32, i32) {
    %c0_i32 = arith.constant 0 : i32
    %c0_i32_0 = arith.constant 0 : i32
    %c0_i32_1 = arith.constant 0 : i32
    return %c0_i32, %c0_i32_0 : i32, i32
  }
  func.func @transform_2(%arg0: i32) -> (i32, i32) {
    %c0_i32 = arith.constant 0 : i32
    %c0_i32_0 = arith.constant 0 : i32
    %c0_i32_1 = arith.constant 0 : i32
    return %c0_i32, %c0_i32_0 : i32, i32
  }
  func.func @transform_3(%arg0: i32) -> (i32, i32) {
    %c0_i32 = arith.constant 0 : i32
    %c0_i32_0 = arith.constant 0 : i32
    %c0_i32_1 = arith.constant 0 : i32
    return %c0_i32, %c0_i32_0 : i32, i32
  }
  func.func @transform_4(%arg0: i32) -> (i32, i32) {
    %c0_i32 = arith.constant 0 : i32
    %c0_i32_0 = arith.constant 0 : i32
    %c0_i32_1 = arith.constant 0 : i32
    return %c0_i32, %c0_i32_0 : i32, i32
  }
  func.func @transform_5(%arg0: i32) -> (i32, i32) {
    %c0_i32 = arith.constant 0 : i32
    %c0_i32_0 = arith.constant 0 : i32
    %c0_i32_1 = arith.constant 0 : i32
    return %c0_i32, %c0_i32_0 : i32, i32
  }
  func.func @transform_6(%arg0: i32) -> (i32, i32) {
    %c0_i32 = arith.constant 0 : i32
    %c0_i32_0 = arith.constant 0 : i32
    %c0_i32_1 = arith.constant 0 : i32
    return %c0_i32, %c0_i32_0 : i32, i32
  }
  func.func @transform_7(%arg0: i32) -> (i32, i32) {
    %c0_i32 = arith.constant 0 : i32
    %c0_i32_0 = arith.constant 0 : i32
    return %arg0, %c0_i32 : i32, i32
  }
}

</mosaic_0001>

<bundles_post_ra>
// kernel: botnn_forward.1
= control target key start
LH: loop header
LB: loop body
LE: loop exit
PB: predicated region body
PF: predicated region fallthrough
CT: control target
= control target key end

     0   :  { %12 = vsyncpa [#allocation3], 0  ;;  %s708_s0 = inlined_call_operand.vmem [shape: f32[8,32], index: 0, kind: input, shape index: {}]   ;;  %s709_s1 = inlined_call_operand.hbm [shape: f32[32,128], index: 1, kind: input, shape index: {}]   ;;  %s710_s2 = inlined_call_operand.vmem [shape: f32[1,128], index: 2, kind: input, shape index: {}]   ;;  %s711_s3 = inlined_call_operand.vmem [shape: f32[128,128], index: 3, kind: input, shape index: {}]   ;;  %s712_s4 = inlined_call_operand.vmem [shape: f32[1,128], index: 4, kind: input, shape index: {}]   ;;  %s713_s5 = inlined_call_operand.vmem [shape: f32[128,16], index: 5, kind: input, shape index: {}]   ;;  %s714_s6 = inlined_call_operand.vmem [shape: f32[1,16], index: 6, kind: input, shape index: {}]   ;;  %s715_s7 = inlined_call_operand.hbm [shape: f32[8,16], index: 7, kind: output, shape index: {}]  }
   0x1   :  { %13 = vsyncpa [#allocation4], 0  ;;  %s506_s24 = smov [#allocation2]  }
   0x2   :  { %s21_s25 = sshll.u32 %s506_s24, 4  ;;  %s22_s25 = int_to_ptr.vmem [resolvable:$true] %s21_s25 }
   0x3   :  { %s470_s26 = scalar_lea.vmem %s22_s25, 512  ;;  %p475_p1 = scmp.lt.s32.totalorder %s22_s25, %s22_s25 }
   0x4   :  { %p471_p0 = scmp.ne.s32.totalorder %s22_s25, %s470_s26  ;;  %p476_p2 = scmp.lt.s32.totalorder %s470_s26, %s470_s26 }
   0x6   :  { %p477_p3 = por %p476_p2, %p475_p1 }
   0x8   :  { %p478_p4 = pnand %p477_p3, %p471_p0 }
   0xa   :  { %481 = shalt.err (!%p478_p4)
}
   0xb   :  { %s507_s27 = smov 128   ;;  %s508_s28 = smov 8  }
   0xc   :  { %27 = dma.hbm_to_vmem [thread:$0]  %s709_s1, 512, %s22_s25, [#allocation3], %s507_s27, %s507_s27, %s508_s28  }
   0xd   :  { %502 = dma.done.wait [#allocation3], 512  }
   0xe   :  { %503 = vsyncadd [#allocation3], 4294966784  ;;  %v509_v0 = vmov 0.0   ;;  %vm510_vm0 = vmmov 0   ;;  %v45_v1 = vld [vmem:[#allocation2 + $0x18] sm:$0xff]  ;;  %v44_v2 = vld [vmem:[#allocation2 + $0x10] sm:$0xff] }
   0xf   :  { %375 = vmatprep.subr.mxu0 %v509_v0  ;;  %383 = vmatprep.mubr.msk.f32.mxu0 %vm510_vm0, %v509_v0  ;;  %v143_v3 = vld [vmem:[%s711_s3 + $0x78] sm:$0xff]  ;;  %v43_v4 = vld [vmem:[#allocation2 + $0x8] sm:$0xff]  ;;  %v142_v5 = vld [vmem:[%s711_s3 + $0x70] sm:$0xff]  ;;  %vm53_vm1 = vcmask 261120   ;;  %s511_s25 = smov [#allocation5]   ;;  %vm315_vm2 = vcmask 130048  }
  0x10   :  { %386 = vmatprep.subr.mxu1 %v509_v0  ;;  %418 = vmatprep.mubr.msk.f32.mxu1 %vm510_vm0, %v509_v0  ;;  %v141_v6 = vld [vmem:[%s711_s3 + $0x68] sm:$0xff]  ;;  %v42_v7 = vld [vmem:[#allocation2] sm:$0xff]  ;;  %v139_v10 = vld [vmem:[%s711_s3 + $0x58] sm:$0xff]  ;;  %s323_s26 = sshll.u32 %s511_s25, 4  ;;  %s324_s26 = int_to_ptr.vmem [resolvable:$true] %s323_s26 }
  0x11   :  { %376 = vmatpush3.msra.mxu0 %v45_v1  ;;  %387 = vmatpush3.msra.mxu1 %v143_v3  ;;  %v41_v8 = vld [vmem:[%s708_s0] sm:$0xff]  ;;  %v138_v11 = vld [vmem:[%s711_s3 + $0x50] sm:$0xff]  ;;  %v137_v12 = vld [vmem:[%s711_s3 + $0x48] sm:$0xff]  ;;  %p487_p6 = scmp.lt.s32.totalorder %s324_s26, %s324_s26 }
  0x12   :  { %377 = vmatprep.subr.mxu0 %v509_v0  ;;  %388 = vmatprep.subr.mxu1 %v509_v0  ;;  %v140_v9 = vld [vmem:[%s711_s3 + $0x60] sm:$0xff]  ;;  %v135_v14 = vld [vmem:[%s711_s3 + $0x38] sm:$0xff]  ;;  %v134_v15 = vld [vmem:[%s711_s3 + $0x30] sm:$0xff] }
  0x13   :  { %378 = vmatpush3.msra.mxu0 %v44_v2  ;;  %389 = vmatpush3.msra.mxu1 %v142_v5  ;;  %v136_v13 = vld [vmem:[%s711_s3 + $0x40] sm:$0xff]  ;;  %v133_v16 = vld [vmem:[%s711_s3 + $0x28] sm:$0xff]  ;;  %v131_v18 = vld [vmem:[%s711_s3 + $0x18] sm:$0xff] }
  0x14   :  { %379 = vmatprep.subr.mxu0 %v509_v0  ;;  %390 = vmatprep.subr.mxu1 %v509_v0  ;;  %v132_v17 = vld [vmem:[%s711_s3 + $0x20] sm:$0xff]  ;;  %v130_v19 = vld [vmem:[%s711_s3 + $0x10] sm:$0xff]  ;;  %v129_v20 = vld [vmem:[%s711_s3 + $0x8] sm:$0xff] }
  0x15   :  { %380 = vmatpush3.msra.mxu0 %v43_v4  ;;  %391 = vmatpush3.msra.mxu1 %v141_v6  ;;  %v128_v21 = vld [vmem:[%s711_s3] sm:$0xff]  ;;  %v237_v22 = vld [vmem:[%s713_s5 + $0x78] sm:$0xff]  ;;  %v236_v23 = vld [vmem:[%s713_s5 + $0x70] sm:$0xff] }
  0x16   :  { %381 = vmatprep.subr.mxu0 %v509_v0  ;;  %392 = vmatprep.subr.mxu1 %v509_v0  ;;  %v235_v24 = vld [vmem:[%s713_s5 + $0x68] sm:$0xff]  ;;  %v234_v25 = vld [vmem:[%s713_s5 + $0x60] sm:$0xff]  ;;  %v233_v26 = vld [vmem:[%s713_s5 + $0x58] sm:$0xff] }
  0x17   :  { %382 = vmatpush3.msra.mxu0 %v42_v7  ;;  %393 = vmatpush3.msra.mxu1 %v140_v9  ;;  %v232_v27 = vld [vmem:[%s713_s5 + $0x50] sm:$0xff]  ;;  %v231_v28 = vld [vmem:[%s713_s5 + $0x48] sm:$0xff]  ;;  %v230_v29 = vld [vmem:[%s713_s5 + $0x40] sm:$0xff] }
  0x18   :  { %384 = vmatmul.mubr.msk.f32.vlgmr.msra.gmra.mxu0 %vm53_vm1, %v41_v8  ;;  %394 = vmatprep.subr.mxu1 %v509_v0  ;;  %v229_v30 = vld [vmem:[%s713_s5 + $0x38] sm:$0xff]  ;;  %v228_v31 = vld [vmem:[%s713_s5 + $0x30] sm:$0xff]  ;;  %v227_v32 = vld [vmem:[%s713_s5 + $0x28] sm:$0xff] }
  0x19   :  { %421 = vmatprep.subr.mxu0 %v509_v0  ;;  %395 = vmatpush3.msra.mxu1 %v139_v10  ;;  %v226_v33 = vld [vmem:[%s713_s5 + $0x20] sm:$0xff]  ;;  %v225_v34 = vld [vmem:[%s713_s5 + $0x18] sm:$0xff]  ;;  %v224_v40 = vld [vmem:[%s713_s5 + $0x10] sm:$0xff] }
  0x1a   :  { %453 = vmatprep.mubr.msk.f32.mxu0 %vm510_vm0, %v509_v0  ;;  %396 = vmatprep.subr.mxu1 %v509_v0  ;;  %v332_v35 = vld [vmem:[%s710_s2] ss:$0 sm:$0xff]  ;;  %v223_v41 = vld [vmem:[%s713_s5 + $0x8] sm:$0xff] }
  0x1b   :  { %397 = vmatpush3.msra.mxu1 %v138_v11  ;;  %422 = vmatpush3.msra.mxu0 %v237_v22  ;;  %v222_v42 = vld [vmem:[%s713_s5] sm:$0xff]  ;;  %s482_s5 = scalar_lea.vmem %s324_s26, 128 }
  0x1c   :  { %398 = vmatprep.subr.mxu1 %v509_v0  ;;  %423 = vmatprep.subr.mxu0 %v509_v0  ;;  %v334_v43 = vld [vmem:[%s712_s4] ss:$0 sm:$0xff]  ;;  %p483_p5 = scmp.ne.s32.totalorder %s324_s26, %s482_s5  ;;  %p488_p7 = scmp.lt.s32.totalorder %s482_s5, %s482_s5 }
  0x1d   :  { %399 = vmatpush3.msra.mxu1 %v137_v12  ;;  %424 = vmatpush3.msra.mxu0 %v236_v23  ;;  %v335_v48 = vld [vmem:[%s714_s6] ss:$0 sm:$0xff] }
  0x1e   :  { %400 = vmatprep.subr.mxu1 %v509_v0  ;;  %425 = vmatprep.subr.mxu0 %v509_v0  ;;  %p489_p8 = por %p488_p7, %p487_p6 }
  0x1f   :  { %401 = vmatpush3.msra.mxu1 %v136_v13  ;;  %426 = vmatpush3.msra.mxu0 %v235_v24 }
  0x20   :  { %402 = vmatprep.subr.mxu1 %v509_v0  ;;  %427 = vmatprep.subr.mxu0 %v509_v0  ;;  %p490_p9 = pnand %p489_p8, %p483_p5 }
  0x21   :  { %403 = vmatpush3.msra.mxu1 %v135_v14  ;;  %428 = vmatpush3.msra.mxu0 %v234_v25 }
  0x22   :  { %404 = vmatprep.subr.mxu1 %v509_v0  ;;  %429 = vmatprep.subr.mxu0 %v509_v0 }
  0x23   :  { %405 = vmatpush3.msra.mxu1 %v134_v15  ;;  %430 = vmatpush3.msra.mxu0 %v233_v26 }
  0x24   :  { %406 = vmatprep.subr.mxu1 %v509_v0  ;;  %431 = vmatprep.subr.mxu0 %v509_v0 }
  0x25   :  { %407 = vmatpush3.msra.mxu1 %v133_v16  ;;  %432 = vmatpush3.msra.mxu0 %v232_v27 }
  0x26   :  { %408 = vmatprep.subr.mxu1 %v509_v0  ;;  %433 = vmatprep.subr.mxu0 %v509_v0 }
  0x27   :  { %409 = vmatpush3.msra.mxu1 %v132_v17  ;;  %434 = vmatpush3.msra.mxu0 %v231_v28 }
  0x28   :  { %410 = vmatprep.subr.mxu1 %v509_v0  ;;  %435 = vmatprep.subr.mxu0 %v509_v0 }
  0x29   :  { %411 = vmatpush3.msra.mxu1 %v131_v18  ;;  %436 = vmatpush3.msra.mxu0 %v230_v29 }
  0x2a   :  { %412 = vmatprep.subr.mxu1 %v509_v0  ;;  %437 = vmatprep.subr.mxu0 %v509_v0 }
  0x2b   :  { %413 = vmatpush3.msra.mxu1 %v130_v19  ;;  %438 = vmatpush3.msra.mxu0 %v229_v30 }
  0x2c   :  { %414 = vmatprep.subr.mxu1 %v509_v0  ;;  %439 = vmatprep.subr.mxu0 %v509_v0 }
  0x2d   :  { %415 = vmatpush3.msra.mxu1 %v129_v20  ;;  %440 = vmatpush3.msra.mxu0 %v228_v31 }
  0x2e   :  { %416 = vmatprep.subr.mxu1 %v509_v0  ;;  %441 = vmatprep.subr.mxu0 %v509_v0 }
  0x2f   :  { %417 = vmatpush3.msra.mxu1 %v128_v21  ;;  %442 = vmatpush3.msra.mxu0 %v227_v32 }
  0x30   :  { %443 = vmatprep.subr.mxu0 %v509_v0 }
  0x31   :  { %444 = vmatpush3.msra.mxu0 %v226_v33 }
  0x32   :  { %445 = vmatprep.subr.mxu0 %v509_v0 }
  0x33   :  { %446 = vmatpush3.msra.mxu0 %v225_v34 }
  0x34   :  { %447 = vmatprep.subr.mxu0 %v509_v0 }
  0x35   :  { %448 = vmatpush3.msra.mxu0 %v224_v40 }
  0x36   :  { %449 = vmatprep.subr.mxu0 %v509_v0 }
  0x37   :  { %450 = vmatpush3.msra.mxu0 %v223_v41 }
  0x38   :  { %451 = vmatprep.subr.mxu0 %v509_v0 }
  0x39   :  { %452 = vmatpush3.msra.mxu0 %v222_v42 }
  0xd8   :  { %v123_v36 = vpop.f32.mrf.mxu0 }
  0xd9   :  { %v124_v37 = vadd.f32 %v332_v35, %v123_v36 }
  0xda   :  { %v385_v38 = vpop.f32.mrf.mxu0 }
  0xdb   :  { %v127_v39 = vmax.f32 %v124_v37, 0.0 }
  0xdd   :  { %419 = vmatmul.mubr.f32.vlgmr.msra.gmra.mxu1 %v127_v39 }
 0x19d   :  { %v217_v44 = vpop.f32.mrf.mxu1 }
 0x19e   :  { %v218_v45 = vadd.f32 %v334_v43, %v217_v44 }
 0x19f   :  { %v420_v46 = vpop.f32.mrf.mxu1 }
 0x1a0   :  { %v221_v47 = vmax.f32 %v218_v45, 0.0 }
 0x1a2   :  { %454 = vmatmul.mubr.f32.vlgmr.msra.gmra.mxu0 %v221_v47 }
 0x262   :  { %v311_v49 = vpop.f32.mrf.mxu0 }
 0x263   :  { %v312_v50 = vadd.f32 %v335_v48, %v311_v49 }
 0x264   :  { %v455_v51 = vpop.f32.mrf.mxu0 }
 0x265   :  { %316 = vst.msk [vmem:[#allocation5] sm:$0xff] %vm315_vm2, %v312_v50 }
 0x266   :  { %493 = shalt.err (!%p490_p9)
}
 0x267   :  { %326 = dma.vmem_to_hbm [thread:$0]  %s324_s26, 128, %s715_s7, [#allocation4]  }
 0x268   :  { %504 = dma.done.wait [#allocation4], 128  }
 0x269   :  { %505 = vsyncadd [#allocation4], 4294967168 }
 0x26a   :  { %330 = vsyncpa [#allocation3], 1 }
 0x26b   :  { %331 = vsyncpa [#allocation4], 1 }

</bundles_post_ra>
